<compile_context>
chip_gen: v5e
topology: v5e:2x2
jax: 0.10.0
libtpu: 0.0.40
codegen_flags: <defaults>
</compile_context>

<pallas_src>
import functools

import jax
import jax.numpy as jnp
from jax import lax
from jax.experimental import pallas as pl
from jax.experimental.pallas import tpu as pltpu


def rwkv_ffn_kernel(x_ref, prev_ref, tmk_ref, tmr_ref, wk_ref, wv_ref, wr_ref,
                    o_ref, *, mix_dtype):
    """One (sequence b, time-tile m) grid step.

    x_ref    : (tile_t, Hp) input rows for this tile (caller dtype)
    prev_ref : (1, Hp)      x[b, m*tile_t - 1] (zeros at sequence start)
    wk/wv/wr : (Hp, Hp)     PRE-TRANSPOSED weights (W^T) -> canonical matmul
    """
    x = x_ref[...]
    tile_t = x.shape[0]

    xm = x.astype(mix_dtype)
    prev = prev_ref[...].astype(mix_dtype)

    # time_shift: shifted[t] = x[t-1]; row 0 comes from prev_ref (zeros at t==0
    # of the sequence, matching ZeroPad2d((0,0,1,-1))).
    shifted = pltpu.roll(xm, shift=1, axis=0)
    row0 = lax.broadcasted_iota(jnp.int32, (tile_t, 1), 0) == 0
    shifted = jnp.where(row0, prev, shifted)

    tmk = tmk_ref[...].astype(mix_dtype)   # (1, Hp), broadcasts over rows
    tmr = tmr_ref[...].astype(mix_dtype)
    xk = xm * tmk + shifted * (1.0 - tmk)
    xr = xm * tmr + shifted * (1.0 - tmr)

    wdt = wk_ref.dtype
    key = jnp.dot(xk.astype(wdt), wk_ref[...],
                  preferred_element_type=jnp.float32)
    r_logit = jnp.dot(xr.astype(wdt), wr_ref[...],
                      preferred_element_type=jnp.float32)
    k_act = jnp.square(jnp.maximum(key, 0.0))            # relu(key)**2 in f32
    value = jnp.dot(k_act.astype(wdt), wv_ref[...],
                    preferred_element_type=jnp.float32)

    o_ref[...] = (jax.nn.sigmoid(r_logit) * value).astype(o_ref.dtype)


def _pick_mix_dtype(x_dtype):
    """bf16 elementwise path on v6e/v7x (bf16 VALU); f32 elsewhere."""
    if jnp.dtype(x_dtype) != jnp.dtype(jnp.bfloat16):
        return jnp.float32
    try:
        kind = jax.devices()[0].device_kind.lower()
    except Exception:
        return jnp.float32
    for old_gen in ("v2", "v3", "v4", "v5"):
        if old_gen in kind:
            return jnp.float32     # no bf16 VPU/EUP before v6
    return jnp.bfloat16


def rwkv_feed_forward(x, time_mix_key, time_mix_receptance,
                      w_key, w_value, w_receptance, *, tile_t=None):
    """x: (B, T, H); time_mix_*: (1, 1, H); w_*: (H, H) torch nn.Linear layout
    (out_features, in_features).  Keep x / w_* in bf16 for production."""
    B, T, H = x.shape
    assert w_key.shape == (H, H)
    assert w_value.shape == (H, H)
    assert w_receptance.shape == (H, H)

    # One-time pre-transpose so the kernel contracts ((1,),(0,)): y = x @ W^T.
    # In production, store the params pre-transposed to avoid even this.
    wk_t = w_key.T
    wv_t = w_value.T
    wr_t = w_receptance.T

    # Lane-dense padding (no-op when H is already a multiple of 128).
    Hp = -(-H // 128) * 128
    if Hp != H:
        pad = Hp - H
        x_p = jnp.pad(x, ((0, 0), (0, 0), (0, pad)))
        wk_t = jnp.pad(wk_t, ((0, pad), (0, pad)))
        wv_t = jnp.pad(wv_t, ((0, pad), (0, pad)))
        wr_t = jnp.pad(wr_t, ((0, pad), (0, pad)))
        tmk = jnp.pad(time_mix_key.reshape(1, H), ((0, 0), (0, pad)))
        tmr = jnp.pad(time_mix_receptance.reshape(1, H), ((0, 0), (0, pad)))
    else:
        x_p = x
        tmk = time_mix_key.reshape(1, H)
        tmr = time_mix_receptance.reshape(1, H)
    tmk = tmk.astype(jnp.float32)
    tmr = tmr.astype(jnp.float32)

    # Row-tile size: larger tiles for small H (amortize per-step overhead),
    # MXU-friendly 256 for large H.  Multiple of 8 sublanes, or the full T.
    if tile_t is None:
        tile_t = 512 if Hp <= 1024 else 256
    tile_t = int(min(tile_t, T))
    if tile_t != T and tile_t % 8 != 0:
        tile_t = max(8, (tile_t // 8) * 8)
    m_tiles = pl.cdiv(T, tile_t)

    # The shifted row 0 of every tile is just x[b, m*tile_t - 1]: pass it as an
    # input block so there is no carried state and both axes are "parallel".
    zeros_row = jnp.zeros((B, 1, Hp), x_p.dtype)
    if m_tiles > 1:
        last_rows = x_p[:, tile_t - 1::tile_t, :]   # last row of tiles 0..m-2
        prev = jnp.concatenate([zeros_row, last_rows], axis=1)[:, :m_tiles, :]
    else:
        prev = zeros_row
    prev = prev.reshape(B, m_tiles, 1, Hp)

    mix_dtype = _pick_mix_dtype(x.dtype)

    w_isz = jnp.dtype(wk_t.dtype).itemsize
    x_isz = jnp.dtype(x.dtype).itemsize
    mix_isz = jnp.dtype(mix_dtype).itemsize
    try:
        vmem_cap = int(pltpu.get_tpu_info().vmem_capacity_bytes)
    except Exception:
        vmem_cap = 64 << 20    # conservative fallback, legal on every gen

    def vmem_limit_for(weight_copies):
        est = (weight_copies * 3 * Hp * Hp * w_isz   # resident W^T blocks
               + 4 * tile_t * Hp * x_isz             # double-buffered x / out
               + 4 * tile_t * Hp * mix_isz           # xm / shifted / xk / xr
               + 4 * tile_t * Hp * 4                 # f32 key/r_logit/k_act/value
               + 16 * Hp * 4)                        # tmk / tmr / prev
        return int(min(max(est + (4 << 20), 32 << 20), int(vmem_cap * 0.85)))

    kernel = functools.partial(rwkv_ffn_kernel, mix_dtype=mix_dtype)

    def run(weight_pipeline_mode, weight_copies):
        def wspec(shape):
            if weight_pipeline_mode is None:
                return pl.BlockSpec(shape, lambda b, m: (0,) * len(shape))
            return pl.BlockSpec(shape, lambda b, m: (0,) * len(shape),
                                pipeline_mode=weight_pipeline_mode)

        grid_spec = pltpu.PrefetchScalarGridSpec(
            num_scalar_prefetch=0,
            grid=(B, m_tiles),
            in_specs=[
                pl.BlockSpec((None, tile_t, Hp), lambda b, m: (b, m, 0)),      # x tile
                pl.BlockSpec((None, None, 1, Hp), lambda b, m: (b, m, 0, 0)),  # prev row
                wspec((1, Hp)),    # time_mix_key
                wspec((1, Hp)),    # time_mix_receptance
                wspec((Hp, Hp)),   # W_key^T        (resident)
                wspec((Hp, Hp)),   # W_value^T      (resident)
                wspec((Hp, Hp)),   # W_receptance^T (resident)
            ],
            out_specs=pl.BlockSpec((None, tile_t, Hp), lambda b, m: (b, m, 0)),
        )
        return pl.pallas_call(
            kernel,
            out_shape=jax.ShapeDtypeStruct((B, T, Hp), x.dtype),
            grid_spec=grid_spec,
            compiler_params=pltpu.CompilerParams(
                dimension_semantics=("parallel", "parallel"),
                vmem_limit_bytes=vmem_limit_for(weight_copies),
            ),
        )(x_p, prev, tmk, tmr, wk_t, wv_t, wr_t)

    try:
        # Single-buffered resident weights (constant index map -> one VMEM copy).
        out = run(pl.Buffered(1), 1)
    except Exception:
        # TODO(synk): drop once pipeline_mode=pl.Buffered(1) is accepted for
        # top-level pallas_call BlockSpecs on all deployed jax versions.
        out = run(None, 2)

    return out[..., :H] if Hp != H else out


def rwkv_feed_forward_ref(x, tmk, tmr, wk, wv, wr):
    """Pure-JAX reference mirroring the PyTorch module exactly."""
    B, T, H = x.shape
    shifted = jnp.concatenate([jnp.zeros((B, 1, H), x.dtype), x[:, :-1, :]], axis=1)
    xk = x * tmk + shifted * (1 - tmk)
    xr = x * tmr + shifted * (1 - tmr)
    key = xk @ wk.T
    receptance = jax.nn.sigmoid(xr @ wr.T)
    value = (jnp.maximum(key, 0.0) ** 2) @ wv.T
    return receptance * value


if __name__ == "__main__":
    B, T, H = 2, 8, 32  # batch, seq, hidden

    key0 = jax.random.PRNGKey(0)
    k_x, k_wk, k_wv, k_wr, k_tmk, k_tmr = jax.random.split(key0, 6)

    x = jax.random.normal(k_x, (B, T, H), dtype=jnp.float32)

    # Deterministic synthetic parameters (nn.Linear-style uniform init).
    bound = float(1.0 / (H ** 0.5))
    w_key = jax.random.uniform(k_wk, (H, H), minval=-bound, maxval=bound, dtype=jnp.float32)
    w_value = jax.random.uniform(k_wv, (H, H), minval=-bound, maxval=bound, dtype=jnp.float32)
    w_receptance = jax.random.uniform(k_wr, (H, H), minval=-bound, maxval=bound, dtype=jnp.float32)
    # Module initializes these to ones; perturb deterministically to exercise the mix math.
    time_mix_key = jax.random.uniform(k_tmk, (1, 1, H), dtype=jnp.float32)
    time_mix_receptance = jax.random.uniform(k_tmr, (1, 1, H), dtype=jnp.float32)

    # 1) f32 path, single T-tile.
    out = rwkv_feed_forward(x, time_mix_key, time_mix_receptance,
                            w_key, w_value, w_receptance)
    out = jax.block_until_ready(out)
    ref = rwkv_feed_forward_ref(x, time_mix_key, time_mix_receptance,
                                w_key, w_value, w_receptance)
    assert out.shape == (B, T, H)
    assert jnp.allclose(out, ref, atol=1e-4, rtol=1e-4), "f32 mismatch vs reference"

    # 2) Multi-tile path: exercises the input-derived cross-tile time-shift row.
    T2 = 32
    x2 = jax.random.normal(jax.random.PRNGKey(1), (B, T2, H), dtype=jnp.float32)
    out2 = rwkv_feed_forward(x2, time_mix_key, time_mix_receptance,
                             w_key, w_value, w_receptance, tile_t=8)
    out2 = jax.block_until_ready(out2)
    ref2 = rwkv_feed_forward_ref(x2, time_mix_key, time_mix_receptance,
                                 w_key, w_value, w_receptance)
    assert jnp.allclose(out2, ref2, atol=1e-4, rtol=1e-4), "multi-tile mismatch vs reference"

    # 3) bf16 path (recommended production dtype): bf16 HBM/DMA/MXU, f32 accumulation,
    #    bf16 mix on v6e+/f32 mix on v5e.
    xb = x.astype(jnp.bfloat16)
    wkb = w_key.astype(jnp.bfloat16)
    wvb = w_value.astype(jnp.bfloat16)
    wrb = w_receptance.astype(jnp.bfloat16)
    out_b = rwkv_feed_forward(xb, time_mix_key, time_mix_receptance, wkb, wvb, wrb)
    out_b = jax.block_until_ready(out_b)
    ref_b = rwkv_feed_forward_ref(xb.astype(jnp.float32), time_mix_key, time_mix_receptance,
                                  wkb.astype(jnp.float32), wvb.astype(jnp.float32),
                                  wrb.astype(jnp.float32))
    assert jnp.allclose(out_b.astype(jnp.float32), ref_b, atol=5e-2, rtol=5e-2), \
        "bf16 mismatch vs reference"

    print("KERNEL_OK")
</pallas_src>

<mosaic_0001>
module attributes {stable_mosaic.version = 11 : i64} {
  func.func @rwkv_ffn_kernel(%arg0: i32, %arg1: i32, %arg2: memref<1x8x128xf32, #tpu.memory_space<vmem>>, %arg3: memref<1x1x1x128xf32, #tpu.memory_space<vmem>>, %arg4: memref<1x128xf32, #tpu.memory_space<vmem>>, %arg5: memref<1x128xf32, #tpu.memory_space<vmem>>, %arg6: memref<128x128xf32, #tpu.memory_space<vmem>>, %arg7: memref<128x128xf32, #tpu.memory_space<vmem>>, %arg8: memref<128x128xf32, #tpu.memory_space<vmem>>, %arg9: memref<1x8x128xf32, #tpu.memory_space<vmem>>) attributes {dimension_semantics = [#tpu.dimension_semantics<parallel>, #tpu.dimension_semantics<parallel>], iteration_bounds = array<i64: 2, 1>, scalar_prefetch = 0 : i64, scratch_operands = 0 : i64, tpu.core_type = #tpu.core_type<tc>, window_params = [{transform_indices = @transform_0, window_bounds = array<i64: 1, 8, 128>}, {transform_indices = @transform_1, window_bounds = array<i64: 1, 1, 1, 128>}, {pipeline_mode = #tpu.pipeline_mode<synchronous>, transform_indices = @transform_2, window_bounds = array<i64: 1, 128>}, {pipeline_mode = #tpu.pipeline_mode<synchronous>, transform_indices = @transform_3, window_bounds = array<i64: 1, 128>}, {pipeline_mode = #tpu.pipeline_mode<synchronous>, transform_indices = @transform_4, window_bounds = array<i64: 128, 128>}, {pipeline_mode = #tpu.pipeline_mode<synchronous>, transform_indices = @transform_5, window_bounds = array<i64: 128, 128>}, {pipeline_mode = #tpu.pipeline_mode<synchronous>, transform_indices = @transform_6, window_bounds = array<i64: 128, 128>}, {transform_indices = @transform_7, window_bounds = array<i64: 1, 8, 128>}]} {
    %c0 = arith.constant 0 : index
    %c0_0 = arith.constant 0 : index
    %c0_1 = arith.constant 0 : index
    %0 = vector.load %arg2[%c0, %c0_0, %c0_1] : memref<1x8x128xf32, #tpu.memory_space<vmem>>, vector<1x8x128xf32>
    %1 = vector.shape_cast %0 : vector<1x8x128xf32> to vector<8x128xf32>
    %c0_2 = arith.constant 0 : index
    %c0_3 = arith.constant 0 : index
    %c0_4 = arith.constant 0 : index
    %c0_5 = arith.constant 0 : index
    %2 = vector.load %arg3[%c0_2, %c0_3, %c0_4, %c0_5] : memref<1x1x1x128xf32, #tpu.memory_space<vmem>>, vector<1x1x1x128xf32>
    %3 = vector.shape_cast %2 : vector<1x1x1x128xf32> to vector<1x128xf32>
    %c1_i32 = arith.constant 1 : i32
    %4 = tpu.dynamic_rotate %1 by %c1_i32 dim 0 : vector<8x128xf32>, i32 -> vector<8x128xf32>
    %5 = tpu.iota {dimensions = array<i32: 0>} : vector<8x1xi32>
    %c0_i32 = arith.constant 0 : i32
    %6 = vector.broadcast %c0_i32 : i32 to vector<8x1xi32>
    %7 = arith.cmpi eq, %5, %6 : vector<8x1xi32>
    %8 = vector.shape_cast %7 : vector<8x1xi1> to vector<8x1xi1>
    %9 = vector.broadcast %8 : vector<8x1xi1> to vector<8x128xi1>
    %10 = vector.shape_cast %3 : vector<1x128xf32> to vector<1x128xf32>
    %11 = vector.broadcast %10 : vector<1x128xf32> to vector<8x128xf32>
    %12 = arith.select %9, %11, %4 : vector<8x128xi1>, vector<8x128xf32>
    %c0_6 = arith.constant 0 : index
    %c0_7 = arith.constant 0 : index
    %13 = vector.load %arg4[%c0_6, %c0_7] : memref<1x128xf32, #tpu.memory_space<vmem>>, vector<1x128xf32>
    %c0_8 = arith.constant 0 : index
    %c0_9 = arith.constant 0 : index
    %14 = vector.load %arg5[%c0_8, %c0_9] : memref<1x128xf32, #tpu.memory_space<vmem>>, vector<1x128xf32>
    %15 = vector.broadcast %13 : vector<1x128xf32> to vector<8x128xf32>
    %16 = arith.mulf %1, %15 : vector<8x128xf32>
    %cst = arith.constant 1.000000e+00 : f32
    %17 = vector.broadcast %cst : f32 to vector<1x128xf32>
    %18 = arith.subf %17, %13 : vector<1x128xf32>
    %19 = vector.broadcast %18 : vector<1x128xf32> to vector<8x128xf32>
    %20 = arith.mulf %12, %19 : vector<8x128xf32>
    %21 = arith.addf %16, %20 : vector<8x128xf32>
    %22 = vector.broadcast %14 : vector<1x128xf32> to vector<8x128xf32>
    %23 = arith.mulf %1, %22 : vector<8x128xf32>
    %cst_10 = arith.constant 1.000000e+00 : f32
    %24 = vector.broadcast %cst_10 : f32 to vector<1x128xf32>
    %25 = arith.subf %24, %14 : vector<1x128xf32>
    %26 = vector.broadcast %25 : vector<1x128xf32> to vector<8x128xf32>
    %27 = arith.mulf %12, %26 : vector<8x128xf32>
    %28 = arith.addf %23, %27 : vector<8x128xf32>
    %c0_11 = arith.constant 0 : index
    %c0_12 = arith.constant 0 : index
    %29 = vector.load %arg6[%c0_11, %c0_12] : memref<128x128xf32, #tpu.memory_space<vmem>>, vector<128x128xf32>
    %cst_13 = arith.constant dense<0.000000e+00> : vector<8x128xf32>
    %30 = tpu.matmul %21, %29, %cst_13 {dimension_numbers = #tpu.dot_dimension_numbers<[1], [0], [0], [1], [0, 0, 1, 1], [], []>} : vector<8x128xf32>, vector<128x128xf32>, vector<8x128xf32> -> vector<8x128xf32>
    %c0_14 = arith.constant 0 : index
    %c0_15 = arith.constant 0 : index
    %31 = vector.load %arg8[%c0_14, %c0_15] : memref<128x128xf32, #tpu.memory_space<vmem>>, vector<128x128xf32>
    %cst_16 = arith.constant dense<0.000000e+00> : vector<8x128xf32>
    %32 = tpu.matmul %28, %31, %cst_16 {dimension_numbers = #tpu.dot_dimension_numbers<[1], [0], [0], [1], [0, 0, 1, 1], [], []>} : vector<8x128xf32>, vector<128x128xf32>, vector<8x128xf32> -> vector<8x128xf32>
    %cst_17 = arith.constant 0.000000e+00 : f32
    %33 = vector.broadcast %cst_17 : f32 to vector<8x128xf32>
    %34 = arith.maximumf %30, %33 : vector<8x128xf32>
    %35 = arith.mulf %34, %34 : vector<8x128xf32>
    %c0_18 = arith.constant 0 : index
    %c0_19 = arith.constant 0 : index
    %36 = vector.load %arg7[%c0_18, %c0_19] : memref<128x128xf32, #tpu.memory_space<vmem>>, vector<128x128xf32>
    %cst_20 = arith.constant dense<0.000000e+00> : vector<8x128xf32>
    %37 = tpu.matmul %35, %36, %cst_20 {dimension_numbers = #tpu.dot_dimension_numbers<[1], [0], [0], [1], [0, 0, 1, 1], [], []>} : vector<8x128xf32>, vector<128x128xf32>, vector<8x128xf32> -> vector<8x128xf32>
    %38 = arith.negf %32 : vector<8x128xf32>
    %39 = math.exp %38 : vector<8x128xf32>
    %cst_21 = arith.constant 1.000000e+00 : f32
    %40 = vector.broadcast %cst_21 : f32 to vector<8x128xf32>
    %41 = arith.addf %40, %39 : vector<8x128xf32>
    %42 = arith.divf %40, %41 : vector<8x128xf32>
    %43 = arith.mulf %42, %37 : vector<8x128xf32>
    %c0_22 = arith.constant 0 : index
    %c0_23 = arith.constant 0 : index
    %c0_24 = arith.constant 0 : index
    %44 = vector.load %arg9[%c0_22, %c0_23, %c0_24] : memref<1x8x128xf32, #tpu.memory_space<vmem>>, vector<1x8x128xf32>
    %45 = vector.shape_cast %44 : vector<1x8x128xf32> to vector<8x128xf32>
    %46 = vector.shape_cast %43 : vector<8x128xf32> to vector<1x8x128xf32>
    tpu.vector_store %arg9[%c0_22, %c0_23, %c0_24], %46 {strides = array<i32>} : memref<1x8x128xf32, #tpu.memory_space<vmem>>, vector<1x8x128xf32>,
    return
  }
  func.func @transform_0(%arg0: i32, %arg1: i32) -> (i32, i32, i32) {
    %c0_i32 = arith.constant 0 : i32
    %c0_i32_0 = arith.constant 0 : i32
    return %arg0, %arg1, %c0_i32 : i32, i32, i32
  }
  func.func @transform_1(%arg0: i32, %arg1: i32) -> (i32, i32, i32, i32) {
    %c0_i32 = arith.constant 0 : i32
    %c0_i32_0 = arith.constant 0 : i32
    %c0_i32_1 = arith.constant 0 : i32
    return %arg0, %arg1, %c0_i32, %c0_i32_0 : i32, i32, i32, i32
  }
  func.func @transform_2(%arg0: i32, %arg1: i32) -> (i32, i32) {
    %c0_i32 = arith.constant 0 : i32
    %c0_i32_0 = arith.constant 0 : i32
    %c0_i32_1 = arith.constant 0 : i32
    return %c0_i32, %c0_i32_0 : i32, i32
  }
  func.func @transform_3(%arg0: i32, %arg1: i32) -> (i32, i32) {
    %c0_i32 = arith.constant 0 : i32
    %c0_i32_0 = arith.constant 0 : i32
    %c0_i32_1 = arith.constant 0 : i32
    return %c0_i32, %c0_i32_0 : i32, i32
  }
  func.func @transform_4(%arg0: i32, %arg1: i32) -> (i32, i32) {
    %c0_i32 = arith.constant 0 : i32
    %c0_i32_0 = arith.constant 0 : i32
    %c0_i32_1 = arith.constant 0 : i32
    return %c0_i32, %c0_i32_0 : i32, i32
  }
  func.func @transform_5(%arg0: i32, %arg1: i32) -> (i32, i32) {
    %c0_i32 = arith.constant 0 : i32
    %c0_i32_0 = arith.constant 0 : i32
    %c0_i32_1 = arith.constant 0 : i32
    return %c0_i32, %c0_i32_0 : i32, i32
  }
  func.func @transform_6(%arg0: i32, %arg1: i32) -> (i32, i32) {
    %c0_i32 = arith.constant 0 : i32
    %c0_i32_0 = arith.constant 0 : i32
    %c0_i32_1 = arith.constant 0 : i32
    return %c0_i32, %c0_i32_0 : i32, i32
  }
  func.func @transform_7(%arg0: i32, %arg1: i32) -> (i32, i32, i32) {
    %c0_i32 = arith.constant 0 : i32
    %c0_i32_0 = arith.constant 0 : i32
    return %arg0, %arg1, %c0_i32 : i32, i32, i32
  }
}

module attributes {stable_mosaic.version = 11 : i64} {
  func.func @rwkv_ffn_kernel(%arg0: i32, %arg1: i32, %arg2: memref<1x8x128xf32, #tpu.memory_space<vmem>>, %arg3: memref<1x1x1x128xf32, #tpu.memory_space<vmem>>, %arg4: memref<1x128xf32, #tpu.memory_space<vmem>>, %arg5: memref<1x128xf32, #tpu.memory_space<vmem>>, %arg6: memref<128x128xf32, #tpu.memory_space<vmem>>, %arg7: memref<128x128xf32, #tpu.memory_space<vmem>>, %arg8: memref<128x128xf32, #tpu.memory_space<vmem>>, %arg9: memref<1x8x128xf32, #tpu.memory_space<vmem>>) attributes {dimension_semantics = [#tpu.dimension_semantics<parallel>, #tpu.dimension_semantics<parallel>], iteration_bounds = array<i64: 2, 1>, scalar_prefetch = 0 : i64, scratch_operands = 0 : i64, tpu.core_type = #tpu.core_type<tc>, window_params = [{transform_indices = @transform_0, window_bounds = array<i64: 1, 8, 128>}, {transform_indices = @transform_1, window_bounds = array<i64: 1, 1, 1, 128>}, {pipeline_mode = #tpu.pipeline_mode<synchronous>, transform_indices = @transform_2, window_bounds = array<i64: 1, 128>}, {pipeline_mode = #tpu.pipeline_mode<synchronous>, transform_indices = @transform_3, window_bounds = array<i64: 1, 128>}, {pipeline_mode = #tpu.pipeline_mode<synchronous>, transform_indices = @transform_4, window_bounds = array<i64: 128, 128>}, {pipeline_mode = #tpu.pipeline_mode<synchronous>, transform_indices = @transform_5, window_bounds = array<i64: 128, 128>}, {pipeline_mode = #tpu.pipeline_mode<synchronous>, transform_indices = @transform_6, window_bounds = array<i64: 128, 128>}, {transform_indices = @transform_7, window_bounds = array<i64: 1, 8, 128>}]} {
    %c0 = arith.constant 0 : index
    %c0_0 = arith.constant 0 : index
    %c0_1 = arith.constant 0 : index
    %0 = vector.load %arg2[%c0, %c0_0, %c0_1] : memref<1x8x128xf32, #tpu.memory_space<vmem>>, vector<1x8x128xf32>
    %1 = vector.shape_cast %0 : vector<1x8x128xf32> to vector<8x128xf32>
    %c0_2 = arith.constant 0 : index
    %c0_3 = arith.constant 0 : index
    %c0_4 = arith.constant 0 : index
    %c0_5 = arith.constant 0 : index
    %2 = vector.load %arg3[%c0_2, %c0_3, %c0_4, %c0_5] : memref<1x1x1x128xf32, #tpu.memory_space<vmem>>, vector<1x1x1x128xf32>
    %3 = vector.shape_cast %2 : vector<1x1x1x128xf32> to vector<1x128xf32>
    %c1_i32 = arith.constant 1 : i32
    %4 = tpu.dynamic_rotate %1 by %c1_i32 dim 0 : vector<8x128xf32>, i32 -> vector<8x128xf32>
    %5 = tpu.iota {dimensions = array<i32: 0>} : vector<8x1xi32>
    %c0_i32 = arith.constant 0 : i32
    %6 = vector.broadcast %c0_i32 : i32 to vector<8x1xi32>
    %7 = arith.cmpi eq, %5, %6 : vector<8x1xi32>
    %8 = vector.shape_cast %7 : vector<8x1xi1> to vector<8x1xi1>
    %9 = vector.broadcast %8 : vector<8x1xi1> to vector<8x128xi1>
    %10 = vector.shape_cast %3 : vector<1x128xf32> to vector<1x128xf32>
    %11 = vector.broadcast %10 : vector<1x128xf32> to vector<8x128xf32>
    %12 = arith.select %9, %11, %4 : vector<8x128xi1>, vector<8x128xf32>
    %c0_6 = arith.constant 0 : index
    %c0_7 = arith.constant 0 : index
    %13 = vector.load %arg4[%c0_6, %c0_7] : memref<1x128xf32, #tpu.memory_space<vmem>>, vector<1x128xf32>
    %c0_8 = arith.constant 0 : index
    %c0_9 = arith.constant 0 : index
    %14 = vector.load %arg5[%c0_8, %c0_9] : memref<1x128xf32, #tpu.memory_space<vmem>>, vector<1x128xf32>
    %15 = vector.broadcast %13 : vector<1x128xf32> to vector<8x128xf32>
    %16 = arith.mulf %1, %15 : vector<8x128xf32>
    %cst = arith.constant 1.000000e+00 : f32
    %17 = vector.broadcast %cst : f32 to vector<1x128xf32>
    %18 = arith.subf %17, %13 : vector<1x128xf32>
    %19 = vector.broadcast %18 : vector<1x128xf32> to vector<8x128xf32>
    %20 = arith.mulf %12, %19 : vector<8x128xf32>
    %21 = arith.addf %16, %20 : vector<8x128xf32>
    %22 = vector.broadcast %14 : vector<1x128xf32> to vector<8x128xf32>
    %23 = arith.mulf %1, %22 : vector<8x128xf32>
    %cst_10 = arith.constant 1.000000e+00 : f32
    %24 = vector.broadcast %cst_10 : f32 to vector<1x128xf32>
    %25 = arith.subf %24, %14 : vector<1x128xf32>
    %26 = vector.broadcast %25 : vector<1x128xf32> to vector<8x128xf32>
    %27 = arith.mulf %12, %26 : vector<8x128xf32>
    %28 = arith.addf %23, %27 : vector<8x128xf32>
    %c0_11 = arith.constant 0 : index
    %c0_12 = arith.constant 0 : index
    %29 = vector.load %arg6[%c0_11, %c0_12] : memref<128x128xf32, #tpu.memory_space<vmem>>, vector<128x128xf32>
    %cst_13 = arith.constant dense<0.000000e+00> : vector<8x128xf32>
    %30 = tpu.matmul %21, %29, %cst_13 {dimension_numbers = #tpu.dot_dimension_numbers<[1], [0], [0], [1], [0, 0, 1, 1], [], []>} : vector<8x128xf32>, vector<128x128xf32>, vector<8x128xf32> -> vector<8x128xf32>
    %c0_14 = arith.constant 0 : index
    %c0_15 = arith.constant 0 : index
    %31 = vector.load %arg8[%c0_14, %c0_15] : memref<128x128xf32, #tpu.memory_space<vmem>>, vector<128x128xf32>
    %cst_16 = arith.constant dense<0.000000e+00> : vector<8x128xf32>
    %32 = tpu.matmul %28, %31, %cst_16 {dimension_numbers = #tpu.dot_dimension_numbers<[1], [0], [0], [1], [0, 0, 1, 1], [], []>} : vector<8x128xf32>, vector<128x128xf32>, vector<8x128xf32> -> vector<8x128xf32>
    %cst_17 = arith.constant 0.000000e+00 : f32
    %33 = vector.broadcast %cst_17 : f32 to vector<8x128xf32>
    %34 = arith.maximumf %30, %33 : vector<8x128xf32>
    %35 = arith.mulf %34, %34 : vector<8x128xf32>
    %c0_18 = arith.constant 0 : index
    %c0_19 = arith.constant 0 : index
    %36 = vector.load %arg7[%c0_18, %c0_19] : memref<128x128xf32, #tpu.memory_space<vmem>>, vector<128x128xf32>
    %cst_20 = arith.constant dense<0.000000e+00> : vector<8x128xf32>
    %37 = tpu.matmul %35, %36, %cst_20 {dimension_numbers = #tpu.dot_dimension_numbers<[1], [0], [0], [1], [0, 0, 1, 1], [], []>} : vector<8x128xf32>, vector<128x128xf32>, vector<8x128xf32> -> vector<8x128xf32>
    %38 = arith.negf %32 : vector<8x128xf32>
    %39 = math.exp %38 : vector<8x128xf32>
    %cst_21 = arith.constant 1.000000e+00 : f32
    %40 = vector.broadcast %cst_21 : f32 to vector<8x128xf32>
    %41 = arith.addf %40, %39 : vector<8x128xf32>
    %42 = arith.divf %40, %41 : vector<8x128xf32>
    %43 = arith.mulf %42, %37 : vector<8x128xf32>
    %c0_22 = arith.constant 0 : index
    %c0_23 = arith.constant 0 : index
    %c0_24 = arith.constant 0 : index
    %44 = vector.load %arg9[%c0_22, %c0_23, %c0_24] : memref<1x8x128xf32, #tpu.memory_space<vmem>>, vector<1x8x128xf32>
    %45 = vector.shape_cast %44 : vector<1x8x128xf32> to vector<8x128xf32>
    %46 = vector.shape_cast %43 : vector<8x128xf32> to vector<1x8x128xf32>
    tpu.vector_store %arg9[%c0_22, %c0_23, %c0_24], %46 {strides = array<i32>} : memref<1x8x128xf32, #tpu.memory_space<vmem>>, vector<1x8x128xf32>,
    return
  }
  func.func @transform_0(%arg0: i32, %arg1: i32) -> (i32, i32, i32) {
    %c0_i32 = arith.constant 0 : i32
    %c0_i32_0 = arith.constant 0 : i32
    return %arg0, %arg1, %c0_i32 : i32, i32, i32
  }
  func.func @transform_1(%arg0: i32, %arg1: i32) -> (i32, i32, i32, i32) {
    %c0_i32 = arith.constant 0 : i32
    %c0_i32_0 = arith.constant 0 : i32
    %c0_i32_1 = arith.constant 0 : i32
    return %arg0, %arg1, %c0_i32, %c0_i32_0 : i32, i32, i32, i32
  }
  func.func @transform_2(%arg0: i32, %arg1: i32) -> (i32, i32) {
    %c0_i32 = arith.constant 0 : i32
    %c0_i32_0 = arith.constant 0 : i32
    %c0_i32_1 = arith.constant 0 : i32
    return %c0_i32, %c0_i32_0 : i32, i32
  }
  func.func @transform_3(%arg0: i32, %arg1: i32) -> (i32, i32) {
    %c0_i32 = arith.constant 0 : i32
    %c0_i32_0 = arith.constant 0 : i32
    %c0_i32_1 = arith.constant 0 : i32
    return %c0_i32, %c0_i32_0 : i32, i32
  }
  func.func @transform_4(%arg0: i32, %arg1: i32) -> (i32, i32) {
    %c0_i32 = arith.constant 0 : i32
    %c0_i32_0 = arith.constant 0 : i32
    %c0_i32_1 = arith.constant 0 : i32
    return %c0_i32, %c0_i32_0 : i32, i32
  }
  func.func @transform_5(%arg0: i32, %arg1: i32) -> (i32, i32) {
    %c0_i32 = arith.constant 0 : i32
    %c0_i32_0 = arith.constant 0 : i32
    %c0_i32_1 = arith.constant 0 : i32
    return %c0_i32, %c0_i32_0 : i32, i32
  }
  func.func @transform_6(%arg0: i32, %arg1: i32) -> (i32, i32) {
    %c0_i32 = arith.constant 0 : i32
    %c0_i32_0 = arith.constant 0 : i32
    %c0_i32_1 = arith.constant 0 : i32
    return %c0_i32, %c0_i32_0 : i32, i32
  }
  func.func @transform_7(%arg0: i32, %arg1: i32) -> (i32, i32, i32) {
    %c0_i32 = arith.constant 0 : i32
    %c0_i32_0 = arith.constant 0 : i32
    return %arg0, %arg1, %c0_i32 : i32, i32, i32
  }
}

</mosaic_0001>

<bundles_post_ra>
// kernel: tpu_custom_call.1
= control target key start
LH: loop header
LB: loop body
LE: loop exit
PB: predicated region body
PF: predicated region fallthrough
CT: control target
= control target key end

     0   :  { %s1328_s0 = inlined_call_operand.hbm [shape: f32[2,8,128], index: 0, kind: input, shape index: {}]   ;;  %s1329_s1 = inlined_call_operand.hbm [shape: f32[2,1,1,128], index: 1, kind: input, shape index: {}]   ;;  %s1330_s2 = inlined_call_operand.vmem [shape: f32[1,128], index: 2, kind: input, shape index: {}]   ;;  %s1331_s3 = inlined_call_operand.vmem [shape: f32[1,128], index: 3, kind: input, shape index: {}]   ;;  %s1332_s4 = inlined_call_operand.hbm [shape: f32[128,128], index: 4, kind: input, shape index: {}]   ;;  %s1333_s5 = inlined_call_operand.hbm [shape: f32[128,128], index: 5, kind: input, shape index: {}]   ;;  %s1334_s6 = inlined_call_operand.hbm [shape: f32[128,128], index: 6, kind: input, shape index: {}]   ;;  %s1335_s7 = inlined_call_operand.hbm [shape: f32[2,8,128], index: 7, kind: output, shape index: {}]  }
   0x1   :  { %1340 = sst [smem:[#allocation22_spill]] %s1332_s4 }
   0x2   :  { %1341 = sst [smem:[#allocation23_spill]] %s1333_s5 }
   0x3   :  { %1342 = sst [smem:[#allocation24_spill]] %s1334_s6 }
   0x4   :  { %12 = vsyncpa [#allocation3], 0 }
   0x5   :  { %14 = vsyncpa [#allocation3 + $0x1], 0 }
   0x6   :  { %15 = vsyncpa [#allocation6], 0 }
   0x7   :  { %17 = vsyncpa [#allocation6 + $0x1], 0 }
   0x8   :  { %18 = vsyncpa [#allocation9], 0 }
   0x9   :  { %19 = vsyncpa [#allocation4], 0 }
   0xa   :  { %21 = vsyncpa [#allocation4 + $0x1], 0  ;;  %s1128_s24 = smov 0   ;;  %s1130_s25 = smov 0  }
   0xb   :  { %s1132_s26 = smov 0   ;;  %s1134_s27 = smov 0  }
   0xc   :  { %s1136_s28 = smov 0   ;;  %s1138_s29 = smov 0  }
   0xd LB: > { %1343 = sst [smem:[#allocation17_spill]] %s1061_s24  ;;  %s1159_s30 = sadd.s32 4294967295, %s1081_s29   ;;  %s1081_s29 = sphi %s1138_s29, %s27_s29   ;;  %s1077_s28 = sphi %s1136_s28, %s1365_s28   ;;  %s1073_s27 = sphi %s1134_s27, %s1364_s27   ;;  %s1069_s26 = sphi %s1132_s26, %s1360_s26   ;;  %s1065_s25 = sphi %s1130_s25, %s1363_s25   ;;  %s1061_s24 = sphi %s1128_s24, %s1362_s24  }
   0xe   : > { %1344 = sst [smem:[#allocation18_spill]] %s1069_s26  ;;  %p712_p0 = scmp.ge.s32.totalorder %s1081_s29, 1 }
   0xf   : > { %p62_p1 = scmp.eq.s32.totalorder %s1159_s30, 0  ;;  %p233_p2 = scmp.lt.s32.totalorder %s1081_s29, 3 }
  0x10   : > { %s1345_s4 = sld [smem:[#allocation22_spill]]  ;;  %s1083_s12 = smov [#allocation7]  }
  0x11   : > { %p1167_p3 = pnand %p712_p0, %p233_p2  ;;  %s252_s13 = sshll.u32 %s1083_s12, 4  ;;  %s253_s13 = int_to_ptr.vmem [resolvable:$true] %s252_s13 }
  0x12   : > { %p716_p6 = scmp.ge.s32.totalorder %s1081_s29, 2  ;;  %s1348_s5 = sld [smem:[#allocation23_spill]] }
  0x13   : > { %p748_p4 = pneg %p1167_p3  ;;  %s1084_s18 = smov 128  }
  0x14   : > { %s1085_s19 = smov 8   ;;  %s1086_s20 = smov [#allocation8]  }
  0x15   : > { %p1175_p5 = pnand %p748_p4, %p62_p1  ;;  %s266_s21 = sshll.u32 %s1086_s20, 4  ;;  %s267_s21 = int_to_ptr.vmem [resolvable:$true] %s266_s21 }
  0x16   : > { %s250_s10 = sshll.u32 %s1345_s4, 4  ;;  %s1349_s6 = sld [smem:[#allocation24_spill]]  ;;  %s251_s10 = int_to_ptr.hbm [resolvable:$true] %s250_s10 }
  0x17   : > { %751 = dma.hbm_to_vmem [thread:$0]  (!%p1175_p5), %s251_s10, 2048, %s253_s13, [#allocation6], %s1084_s18, %s1084_s18, %s1085_s19  }
  0x18   : > { %s264_s17 = sshll.u32 %s1348_s5, 4  ;;  %s1087_s9 = smov [#allocation10]   ;;  %s265_s17 = int_to_ptr.hbm [resolvable:$true] %s264_s17 }
  0x19   : > { %754 = dma.hbm_to_vmem [thread:$0]  (!%p1175_p5), %s265_s17, 2048, %s267_s21, [#allocation9], %s1084_s18, %s1084_s18, %s1085_s19  }
  0x1a   : > { %s280_s12 = sshll.u32 %s1087_s9, 4  ;;  %s711_s10 = sadd.s32 4294967294, %s1081_s29   ;;  %s281_s12 = int_to_ptr.vmem [resolvable:$true] %s280_s12 }
  0x1b   : > { %s39_s13 = sadd.s32 1, %s1077_s28  ;;  %s48_s15 = sadd.s32 1, %s1069_s26 }
  0x1c   : > { %s278_s8 = sshll.u32 %s1349_s6, 4  ;;  %p41_p7 = scmp.ge.s32.totalorder %s39_s13, 2  ;;  %s279_s8 = int_to_ptr.hbm [resolvable:$true] %s278_s8 }
  0x1d   : > { %757 = dma.hbm_to_vmem [thread:$0]  (!%p1175_p5), %s279_s8, 2048, %s281_s12, [#allocation9], %s1084_s18, %s1084_s18, %s1085_s19  }
  0x1e   : > { %p55_p8 = scmp.ne.s32.totalorder %s1069_s26, %s1065_s25  ;;  %p56_p9 = scmp.eq.s32.totalorder %s1081_s29, 0 }
  0x1f   : > { %p61_p10 = scmp.ne.s32.totalorder %s1065_s25, %s1061_s24  ;;  %s1367_s13 = smov (%p41_p7, %s39_s13), 0 }
  0x20   : > { %1350 = sst [smem:[#allocation19_spill]] %s1367_s13  ;;  %p1202_p11 = por %p56_p9, %p55_p8 }
  0x21   : > { %p1208_p12 = por %p62_p1, %p61_p10  ;;  %s43_s17 = ssub.s32 %s1077_s28, %s1367_s13 }
  0x22   : > { %p220_p13 = scmp.eq.s32.totalorder %s1159_s30, 1  ;;  %p46_p0 = scmp.eq.s32.totalorder %s43_s17, 0 }
  0x23   : > { %p226_p2 = scmp.eq.s32.totalorder %s711_s10, 1  ;;  %p772_p5 = scmp.lt.s32.totalorder %s1081_s29, 2 }
  0x24   : > { %p1215_p4 = por %p220_p13, %p55_p8  ;;  %s294_s21 = sand.u32 1, %s1069_s26  }
  0x25   : > { %s1221_s19 = scalar_select %p46_p0, %s1069_s26, %s48_s15  }
  0x26   : > { %p1223_p7 = por %p226_p2, %p61_p10  ;;  %s717_s22 = sshll.u32 %s294_s21, 3 }
  0x27   : > { %1354 = sst [smem:[#allocation20_spill]] %s1221_s19  ;;  %s718_s23 = sshll.u32 %s1077_s28, 3 }
  0x28   : > { %s1355_s20 = scalar_select %p1223_p7, 1, 0 }
  0x29   : > { %s303_s12 = scalar_lea.hbm %s1328_s0, %s718_s23  ;;  %s298_s10 = scalar_lea.vmem [#allocation2], %s717_s22 }
  0x2a   : > { %1356 = sst [smem:[#allocation21_spill]] %s1355_s20  ;;  %s307_s17 = sshll.u32 %s298_s10, 4  ;;  %s308_s17 = int_to_ptr.vmem [resolvable:$true] %s307_s17 }
  0x2b   : > { %s305_s4 = sshll.u32 %s303_s12, 4  ;;  %p759_p8 = pnand %p772_p5, %p1202_p11  ;;  %s306_s4 = int_to_ptr.hbm [resolvable:$true] %s305_s4 }
  0x2c   : > { %s314_s15 = sand.u32 1, %s1081_s29   ;;  %s295_s5 = scalar_lea.sflag [#allocation3], %s294_s21 }
  0x2d   : > { %761 = dma.hbm_to_vmem [thread:$0]  (!%p759_p8), %s306_s4, 128, %s308_s17, %s295_s5  }
  0x2e   : > { %s321_s19 = scalar_lea.hbm %s1329_s1, %s1077_s28  ;;  %s317_s26 = scalar_lea.vmem [#allocation5], %s294_s21 }
  0x2f   : > { %s325_s20 = sshll.u32 %s317_s26, 4  ;;  %s323_s24 = sshll.u32 %s321_s19, 4  ;;  %s326_s20 = int_to_ptr.vmem [resolvable:$true] %s325_s20  ;;  %s324_s24 = int_to_ptr.hbm [resolvable:$true] %s323_s24 }
  0x30   : > { %s315_s23 = scalar_lea.sflag [#allocation6], %s314_s15  ;;  %334 = sbr.rel (%p1167_p3) target bundleno = 360 (0x168), region = 48 }
  0x31   : > { %764 = dma.hbm_to_vmem [thread:$0]  (!%p759_p8), %s324_s24, 16, %s326_s20, %s315_s23  }
  0x32   : > { %s1242_s16 = sand.u32 (!%p1167_p3), 1, %s1065_s25  }
  0x33   : > { %s720_s4 = sshll.u32 (!%p1167_p3), %s1242_s16, 3  ;;  %s337_s5 = scalar_lea.sflag (!%p1167_p3), [#allocation3], %s1242_s16 }
  0x34   : > { %s1248_s6 = scalar_lea.vmem (!%p1167_p3), [#allocation2], %s720_s4 }
  0x35   : > { %1040 = dma.done.wait (%p1208_p12), %s337_s5, 128  }
  0x36   : > { %1042 = vsyncadd (%p1208_p12), %s337_s5, 4294967168  ;;  %s346_s24 = sand.u32 1, %s1159_s30   ;;  %s349_s11 = scalar_lea.vmem [#allocation5], %s1242_s16 }
  0x37   : > { %s347_s26 = scalar_lea.sflag [#allocation6], %s346_s24 }
  0x38   : > { %1044 = dma.done.wait (%p1208_p12), %s347_s26, 16  }
  0x39   : > { %1046 = vsyncadd (%p1208_p12), %s347_s26, 4294967280 }
  0x3a   : > { %1048 = dma.done.wait (%p62_p1), [#allocation6], 2048  }
  0x3b   : > { %1050 = vsyncadd (%p62_p1), [#allocation6], 4294965248 }
  0x3c   : > { %1052 = dma.done.wait (%p62_p1), [#allocation9], 4096  }
  0x3d   : > { %1054 = vsyncadd (%p62_p1), [#allocation9], 4294963200  ;;  %v449_v0 = vld [vmem:[#allocation7 + $0x78] sm:$0xff]  ;;  %v448_v1 = vld [vmem:[#allocation7 + $0x70] sm:$0xff]  ;;  %v403_v10 = vlaneseq  ;;  %s727_s9 = sshll.u32 %s1073_s27, 3  ;;  %s399_s15 = scalar_lea.vmem [#allocation11], %s720_s4 }
  0x3e   : > { %450 = vmatpush.msra.mxu0 %v449_v0  ;;  %v447_v2 = vld [vmem:[#allocation7 + $0x68] sm:$0xff]  ;;  %v446_v3 = vld [vmem:[#allocation7 + $0x60] sm:$0xff]  ;;  %v445_v4 = vld [vmem:[#allocation7 + $0x58] sm:$0xff]  ;;  %s577_s17 = scalar_lea.hbm %s1335_s7, %s727_s9  ;;  %s579_s23 = sshll.u32 %s399_s15, 4  ;;  %s580_s23 = int_to_ptr.vmem [resolvable:$true] %s579_s23 }
  0x3f   : > { %v485_v5 = vld [vmem:[#allocation10 + $0x78] sm:$0xff]  ;;  %v484_v6 = vld [vmem:[#allocation10 + $0x70] sm:$0xff]  ;;  %v483_v8 = vld [vmem:[#allocation10 + $0x68] sm:$0xff]  ;;  %v404_v19 = vshrl.u32 %v403_v10, 7  ;;  %s581_s5 = sshll.u32 %s577_s17, 4  ;;  %s566_s27 = scalar_lea.sflag [#allocation4], %s1242_s16  ;;  %s582_s5 = int_to_ptr.hbm [resolvable:$true] %s581_s5 }
  0x40   : > { %451 = vmatpush.msra.mxu0 %v448_v1  ;;  %486 = vmatpush.msra.mxu1 %v485_v5  ;;  %v444_v7 = vld [vmem:[#allocation7 + $0x50] sm:$0xff]  ;;  %v443_v9 = vld [vmem:[#allocation7 + $0x48] sm:$0xff]  ;;  %v482_v11 = vld [vmem:[#allocation10 + $0x60] sm:$0xff]  ;;  %s1007_s4 = scalar_lea.hbm %s1335_s7, 16 }
  0x41   : > { %v442_v12 = vld [vmem:[#allocation7 + $0x40] sm:$0xff]  ;;  %v481_v13 = vld [vmem:[#allocation10 + $0x58] sm:$0xff]  ;;  %v412_v14 = vld [vmem:[%s1330_s2] sm:$0x1]  ;;  %vm405_vm0 = vcmp.eq.s32.totalorder %v404_v19, 0 }
  0x42   : > { %452 = vmatpush.msra.mxu0 %v447_v2  ;;  %487 = vmatpush.msra.mxu1 %v484_v6  ;;  %v523_v15 = vld [vmem:[#allocation8 + $0x78] sm:$0xff]  ;;  %v522_v16 = vld [vmem:[#allocation8 + $0x70] sm:$0xff]  ;;  %v521_v21 = vld [vmem:[#allocation8 + $0x68] sm:$0xff]  ;;  %v418_v23 = vsub.f32 1.0, %v412_v14 }
  0x43   : > { %v441_v17 = vld [vmem:[#allocation7 + $0x38] sm:$0xff]  ;;  %v480_v20 = vld [vmem:[#allocation10 + $0x50] sm:$0xff]  ;;  %524 = vmatpush.msra.mxu2 %v523_v15  ;;  %v479_v24 = vld [vmem:[#allocation10 + $0x48] sm:$0xff] }
  0x44   : > { %453 = vmatpush.msra.mxu0 %v446_v3  ;;  %488 = vmatpush.msra.mxu1 %v483_v8  ;;  %v1272_v18 = vld [vmem:[%s1248_s6] sm:$0xff]  ;;  %v520_v27 = vld [vmem:[#allocation8 + $0x60] sm:$0xff]  ;;  %v420_v34 = vperm.slane %v418_v23, 0  ;;  %s1001_s6 = sshra.s32 %s582_s5, 4  ;;  %s1002_s6 = int_to_ptr.hbm [resolvable:$true] %s1001_s6 }
  0x45   : > { %v440_v22 = vld [vmem:[#allocation7 + $0x30] sm:$0xff]  ;;  %525 = vmatpush.msra.mxu2 %v522_v16  ;;  %v402_v25 = vrot.slane %v1272_v18, 7  ;;  %v830_v26 = vld [vmem:[%s349_s11] ss:$0 sm:$0xff]  ;;  %v478_v29 = vld [vmem:[#allocation10 + $0x40] sm:$0xff]  ;;  %s1003_s24 = scalar_lea.hbm %s1002_s6, 8  ;;  %p1008_p10 = scmp.lt.s32.totalorder %s1002_s6, %s1335_s7 }
  0x46   : > { %454 = vmatpush.msra.mxu0 %v445_v4  ;;  %489 = vmatpush.msra.mxu1 %v482_v11  ;;  %v439_v28 = vld [vmem:[#allocation7 + $0x28] sm:$0xff]  ;;  %v519_v31 = vld [vmem:[#allocation8 + $0x58] sm:$0xff]  ;;  %v438_v32 = vld [vmem:[#allocation7 + $0x20] sm:$0xff]  ;;  %p1004_p1 = scmp.ne.s32.totalorder %s1002_s6, %s1003_s24  ;;  %p1009_p11 = scmp.lt.s32.totalorder %s1007_s4, %s1003_s24 }
  0x47   : > { %526 = vmatpush.msra.mxu2 %v521_v21  ;;  %v413_v30 = vld [vmem:[%s1331_s3] sm:$0x1]  ;;  %v477_v35 = vld [vmem:[#allocation10 + $0x38] sm:$0xff]  ;;  %v411_v36 = vsel %vm405_vm0, %v830_v26, %v402_v25  ;;  %v518_v37 = vld [vmem:[#allocation8 + $0x50] sm:$0xff] }
  0x48   : > { %455 = vmatpush.msra.mxu0 %v444_v7  ;;  %490 = vmatpush.msra.mxu1 %v481_v13  ;;  %v831_v33 = vld [vmem:[%s1330_s2] ss:$0 sm:$0xff]  ;;  %v437_v38 = vld [vmem:[#allocation7 + $0x18] sm:$0xff]  ;;  %v476_v39 = vld [vmem:[#allocation10 + $0x30] sm:$0xff]  ;;  %v428_v40 = vsub.f32 1.0, %v413_v30  ;;  %v422_v44 = vmul.f32 %v420_v34, %v411_v36  ;;  %p1005_p3 = pnand %p1004_p1, %p1215_p4  ;;  %p1010_p12 = por %p1009_p11, %p1008_p10 }
  0x49   : > { %527 = vmatpush.msra.mxu2 %v520_v27  ;;  %v517_v41 = vld [vmem:[#allocation8 + $0x48] sm:$0xff]  ;;  %v436_v42 = vld [vmem:[#allocation7 + $0x10] sm:$0xff]  ;;  %v417_v43 = vmul.f32 %v831_v33, %v1272_v18  ;;  %v516_v46 = vld [vmem:[#allocation8 + $0x40] sm:$0xff] }
  0x4a   : > { %456 = vmatpush.msra.mxu0 %v443_v9  ;;  %491 = vmatpush.msra.mxu1 %v480_v20  ;;  %v475_v45 = vld [vmem:[#allocation10 + $0x28] sm:$0xff]  ;;  %v474_v48 = vld [vmem:[#allocation10 + $0x20] sm:$0xff]  ;;  %v430_v50 = vperm.slane %v428_v40, 0  ;;  %v515_v51 = vld [vmem:[#allocation8 + $0x38] sm:$0xff]  ;;  %p1006_p9 = pneg %p1005_p3 }
  0x4b   : > { %528 = vmatpush.msra.mxu2 %v519_v31  ;;  %v435_v47 = vld [vmem:[#allocation7 + $0x8] sm:$0xff]  ;;  %v434_v52 = vld [vmem:[#allocation7] sm:$0xff]  ;;  %v423_v53 = vadd.f32 %v422_v44, %v417_v43  ;;  %v473_v54 = vld [vmem:[#allocation10 + $0x18] sm:$0xff] }
  0x4c   : > { %457 = vmatpush.msra.mxu0 %v442_v12  ;;  %492 = vmatpush.msra.mxu1 %v479_v24  ;;  %v832_v49 = vld [vmem:[%s1331_s3] ss:$0 sm:$0xff]  ;;  %v514_v55 = vld [vmem:[#allocation8 + $0x30] sm:$0xff]  ;;  %v432_v58 = vmul.f32 %v430_v50, %v411_v36  ;;  %v512_v61 = vld [vmem:[#allocation8 + $0x20] sm:$0xff]  ;;  %p1011_p13 = pnand %p1010_p12, %p1006_p9 }
  0x4d   : > { %529 = vmatpush.msra.mxu2 %v518_v37  ;;  %v472_v56 = vld [vmem:[#allocation10 + $0x10] sm:$0xff]  ;;  %v427_v57 = vmul.f32 %v832_v49, %v1272_v18  ;;  %v513_v59 = vld [vmem:[#allocation8 + $0x28] sm:$0xff]  ;;  %v470_v62 = vld [vmem:[#allocation10] sm:$0xff] }
  0x4e   : > { %458 = vmatpush.msra.mxu0 %v441_v17  ;;  %493 = vmatpush.msra.mxu1 %v478_v29  ;;  %v471_v60 = vld [vmem:[#allocation10 + $0x8] sm:$0xff]  ;;  %v511_v0 = vld [vmem:[#allocation8 + $0x18] sm:$0xff]  ;;  %v510_v1 = vld [vmem:[#allocation8 + $0x10] sm:$0xff] }
  0x4f   : > { %530 = vmatpush.msra.mxu2 %v517_v41  ;;  %v433_v63 = vadd.f32 %v432_v58, %v427_v57  ;;  %v509_v2 = vld [vmem:[#allocation8 + $0x8] sm:$0xff]  ;;  %v508_v3 = vld [vmem:[#allocation8] sm:$0xff] }
  0x50   : > { %459 = vmatpush.msra.mxu0 %v440_v22  ;;  %494 = vmatpush.msra.mxu1 %v477_v35 }
  0x51   : > { %531 = vmatpush.msra.mxu2 %v516_v46 }
  0x52   : > { %460 = vmatpush.msra.mxu0 %v439_v28  ;;  %495 = vmatpush.msra.mxu1 %v476_v39 }
  0x53   : > { %532 = vmatpush.msra.mxu2 %v515_v51 }
  0x54   : > { %461 = vmatpush.msra.mxu0 %v438_v32  ;;  %496 = vmatpush.msra.mxu1 %v475_v45 }
  0x55   : > { %533 = vmatpush.msra.mxu2 %v514_v55 }
  0x56   : > { %462 = vmatpush.msra.mxu0 %v437_v38  ;;  %497 = vmatpush.msra.mxu1 %v474_v48 }
  0x57   : > { %534 = vmatpush.msra.mxu2 %v513_v59 }
  0x58   : > { %463 = vmatpush.msra.mxu0 %v436_v42  ;;  %498 = vmatpush.msra.mxu1 %v473_v54 }
  0x59   : > { %535 = vmatpush.msra.mxu2 %v512_v61 }
  0x5a   : > { %464 = vmatpush.msra.mxu0 %v435_v47  ;;  %499 = vmatpush.msra.mxu1 %v472_v56 }
  0x5b   : > { %536 = vmatpush.msra.mxu2 %v511_v0 }
  0x5c   : > { %465 = vmatpush.msra.mxu0 %v434_v52  ;;  %500 = vmatpush.msra.mxu1 %v471_v60 }
  0x5d   : > { %466 = vmatmul.f32.vlgmr.msra.gmra.mxu0 %v423_v53  ;;  %537 = vmatpush.msra.mxu2 %v510_v1 }
  0x5e   : > { %501 = vmatpush.msra.mxu1 %v470_v62 }
  0x5f   : > { %502 = vmatmul.f32.vlgmr.msra.gmra.mxu1 %v433_v63  ;;  %538 = vmatpush.msra.mxu2 %v509_v2 }
  0x61   : > { %539 = vmatpush.msra.mxu2 %v508_v3 }
  0xda   : > { %v467_v4 = vpop.f32.mrf.mxu0 }
  0xdb   : > { %v506_v5 = vmax.f32 %v467_v4, 0.0 }
  0xdc   : > { %v503_v7 = vpop.f32.mrf.mxu1 }
  0xdd   : > { %v507_v6 = vmul.f32 %v506_v5, %v506_v5  ;;  %v725_v8 = vmul.f32 -1.442695, %v503_v7 }
  0xdf   : > { %540 = vmatmul.f32.vlgmr.msra.gmra.mxu2 %v507_v6  ;;  %833 = vpow2.f32 %v725_v8 }
  0xe5   : > { %v834_v9 = vpop.eup %833 }
  0xe6   : > { %v547_v10 = vadd.f32 1.0, %v834_v9 }
  0xe8   : > { %835 = vrcp.f32 %v547_v10  ;;  %vm553_vm1 = vweird.f32 %v547_v10  ;;  %v559_v15 = vand.u32 2147483648, %v547_v10  ;;  %v557_v17 = vand.u32 2147483647, %v547_v10 }
  0xea   : > { %v560_v18 = vor.u32 1.1754944e-38, %v559_v15  ;;  %vm558_vm4 = vcmp.eq.f32.partialorder %v557_v17, 8.507059e+37 }
  0xee   : > { %v836_v11 = vpop.eup %835 }
  0xef   : > { %v549_v12 = vmul.f32 %v836_v11, %v547_v10  ;;  %vm554_vm2 = vweird.f32 %v836_v11 }
  0xf0   : > { %vm555_vm3 = vmor %vm553_vm1, %vm554_vm2 }
  0xf1   : > { %v550_v13 = vsub.f32 1.0, %v549_v12 }
  0xf3   : > { %v551_v14 = vmul.f32 %v836_v11, %v550_v13 }
  0xf5   : > { %v552_v16 = vadd.f32 %v836_v11, %v551_v14 }
  0xf7   : > { %v556_v19 = vsel %vm555_vm3, %v836_v11, %v552_v16 }
  0xf8   : > { %v561_v21 = vsel %vm558_vm4, %v560_v18, %v556_v19 }
 0x162   : > { %v541_v20 = vpop.f32.mrf.mxu2 }
 0x163   : > { %v563_v22 = vmul.f32 %v561_v21, %v541_v20 }
 0x165   : > { %564 = vst [vmem:[%s399_s15] sm:$0xff] %v563_v22 }
 0x166   : > { %1014 = shalt.err (!%p1011_p13)
}
 0x167   : > { %746 = dma.vmem_to_hbm [thread:$0]  (%p1215_p4), %s580_s23, 128, %s582_s5, %s566_s27  }
 0x168 PF: > { %s1357_s16 = sld [smem:[#allocation17_spill]]  ;;  %p766_p0 = pnand %p716_p6, %p1223_p7 }
 0x16a   : > { %p767_p2 = pneg %p766_p0 }
 0x16e   : > { %s593_s19 = sand.u32 1, %s1357_s16  }
 0x16f   : > { %s594_s20 = scalar_lea.sflag [#allocation4], %s593_s19 }
 0x170   : > { %1056 = dma.done.wait (%p767_p2), %s594_s20, 128  }
 0x171   : > { %1058 = vsyncadd (%p767_p2), %s594_s20, 4294967168  ;;  %s27_s29 = sadd.s32 1, %s1081_s29   ;;  %s1359_s21 = sld [smem:[#allocation18_spill]] }
 0x172   : > { %p24_p5 = scmp.ge.s32.totalorder %s27_s29, 4   ;;  %s1360_s26 = sld [smem:[#allocation20_spill]] }
 0x173   : > { %s1361_s18 = sld [smem:[#allocation19_spill]]  ;;  %s1362_s24 = smov %s1065_s25 }
 0x174   : > { %s1364_s27 = smov %s1077_s28 }
 0x175   :  { %26 = sbr.rel (!%p24_p5) target bundleno = 13 (0xd), region = 118 }
 0x177   : > { %s1363_s25 = smov %s1359_s21 }
 0x179   : > { %s1365_s28 = smov %s1361_s18 }
 0x17a   :  { %600 = vsyncpa [#allocation3], 1 }
 0x17b   :  { %602 = vsyncpa [#allocation3 + $0x1], 1 }
 0x17c   :  { %603 = vsyncpa [#allocation6], 1 }
 0x17d   :  { %605 = vsyncpa [#allocation6 + $0x1], 1 }
 0x17e   :  { %606 = vsyncpa [#allocation9], 1 }
 0x17f   :  { %607 = vsyncpa [#allocation4], 1 }
 0x180   :  { %609 = vsyncpa [#allocation4 + $0x1], 1 }

// kernel: tpu_custom_call.1
= control target key start
LH: loop header
LB: loop body
LE: loop exit
PB: predicated region body
PF: predicated region fallthrough
CT: control target
= control target key end

     0   :  { %s1328_s0 = inlined_call_operand.hbm [shape: f32[2,8,128], index: 0, kind: input, shape index: {}]   ;;  %s1329_s1 = inlined_call_operand.hbm [shape: f32[2,1,1,128], index: 1, kind: input, shape index: {}]   ;;  %s1330_s2 = inlined_call_operand.vmem [shape: f32[1,128], index: 2, kind: input, shape index: {}]   ;;  %s1331_s3 = inlined_call_operand.vmem [shape: f32[1,128], index: 3, kind: input, shape index: {}]   ;;  %s1332_s4 = inlined_call_operand.hbm [shape: f32[128,128], index: 4, kind: input, shape index: {}]   ;;  %s1333_s5 = inlined_call_operand.hbm [shape: f32[128,128], index: 5, kind: input, shape index: {}]   ;;  %s1334_s6 = inlined_call_operand.hbm [shape: f32[128,128], index: 6, kind: input, shape index: {}]   ;;  %s1335_s7 = inlined_call_operand.hbm [shape: f32[2,8,128], index: 7, kind: output, shape index: {}]  }
   0x1   :  { %1340 = sst [smem:[#allocation22_spill]] %s1332_s4 }
   0x2   :  { %1341 = sst [smem:[#allocation23_spill]] %s1333_s5 }
   0x3   :  { %1342 = sst [smem:[#allocation24_spill]] %s1334_s6 }
   0x4   :  { %12 = vsyncpa [#allocation3], 0 }
   0x5   :  { %14 = vsyncpa [#allocation3 + $0x1], 0 }
   0x6   :  { %15 = vsyncpa [#allocation6], 0 }
   0x7   :  { %17 = vsyncpa [#allocation6 + $0x1], 0 }
   0x8   :  { %18 = vsyncpa [#allocation9], 0 }
   0x9   :  { %19 = vsyncpa [#allocation4], 0 }
   0xa   :  { %21 = vsyncpa [#allocation4 + $0x1], 0  ;;  %s1128_s24 = smov 0   ;;  %s1130_s25 = smov 0  }
   0xb   :  { %s1132_s26 = smov 0   ;;  %s1134_s27 = smov 0  }
   0xc   :  { %s1136_s28 = smov 0   ;;  %s1138_s29 = smov 0  }
   0xd LB: > { %1343 = sst [smem:[#allocation17_spill]] %s1061_s24  ;;  %s1159_s30 = sadd.s32 4294967295, %s1081_s29   ;;  %s1081_s29 = sphi %s1138_s29, %s27_s29   ;;  %s1077_s28 = sphi %s1136_s28, %s1365_s28   ;;  %s1073_s27 = sphi %s1134_s27, %s1364_s27   ;;  %s1069_s26 = sphi %s1132_s26, %s1360_s26   ;;  %s1065_s25 = sphi %s1130_s25, %s1363_s25   ;;  %s1061_s24 = sphi %s1128_s24, %s1362_s24  }
   0xe   : > { %1344 = sst [smem:[#allocation18_spill]] %s1069_s26  ;;  %p712_p0 = scmp.ge.s32.totalorder %s1081_s29, 1 }
   0xf   : > { %p62_p1 = scmp.eq.s32.totalorder %s1159_s30, 0  ;;  %p233_p2 = scmp.lt.s32.totalorder %s1081_s29, 3 }
  0x10   : > { %s1345_s4 = sld [smem:[#allocation22_spill]]  ;;  %s1083_s12 = smov [#allocation7]  }
  0x11   : > { %p1167_p3 = pnand %p712_p0, %p233_p2  ;;  %s252_s13 = sshll.u32 %s1083_s12, 4  ;;  %s253_s13 = int_to_ptr.vmem [resolvable:$true] %s252_s13 }
  0x12   : > { %p716_p6 = scmp.ge.s32.totalorder %s1081_s29, 2  ;;  %s1348_s5 = sld [smem:[#allocation23_spill]] }
  0x13   : > { %p748_p4 = pneg %p1167_p3  ;;  %s1084_s18 = smov 128  }
  0x14   : > { %s1085_s19 = smov 8   ;;  %s1086_s20 = smov [#allocation8]  }
  0x15   : > { %p1175_p5 = pnand %p748_p4, %p62_p1  ;;  %s266_s21 = sshll.u32 %s1086_s20, 4  ;;  %s267_s21 = int_to_ptr.vmem [resolvable:$true] %s266_s21 }
  0x16   : > { %s250_s10 = sshll.u32 %s1345_s4, 4  ;;  %s1349_s6 = sld [smem:[#allocation24_spill]]  ;;  %s251_s10 = int_to_ptr.hbm [resolvable:$true] %s250_s10 }
  0x17   : > { %751 = dma.hbm_to_vmem [thread:$0]  (!%p1175_p5), %s251_s10, 2048, %s253_s13, [#allocation6], %s1084_s18, %s1084_s18, %s1085_s19  }
  0x18   : > { %s264_s17 = sshll.u32 %s1348_s5, 4  ;;  %s1087_s9 = smov [#allocation10]   ;;  %s265_s17 = int_to_ptr.hbm [resolvable:$true] %s264_s17 }
  0x19   : > { %754 = dma.hbm_to_vmem [thread:$0]  (!%p1175_p5), %s265_s17, 2048, %s267_s21, [#allocation9], %s1084_s18, %s1084_s18, %s1085_s19  }
  0x1a   : > { %s280_s12 = sshll.u32 %s1087_s9, 4  ;;  %s711_s10 = sadd.s32 4294967294, %s1081_s29   ;;  %s281_s12 = int_to_ptr.vmem [resolvable:$true] %s280_s12 }
  0x1b   : > { %s39_s13 = sadd.s32 1, %s1077_s28  ;;  %s48_s15 = sadd.s32 1, %s1069_s26 }
  0x1c   : > { %s278_s8 = sshll.u32 %s1349_s6, 4  ;;  %p41_p7 = scmp.ge.s32.totalorder %s39_s13, 2  ;;  %s279_s8 = int_to_ptr.hbm [resolvable:$true] %s278_s8 }
  0x1d   : > { %757 = dma.hbm_to_vmem [thread:$0]  (!%p1175_p5), %s279_s8, 2048, %s281_s12, [#allocation9], %s1084_s18, %s1084_s18, %s1085_s19  }
  0x1e   : > { %p55_p8 = scmp.ne.s32.totalorder %s1069_s26, %s1065_s25  ;;  %p56_p9 = scmp.eq.s32.totalorder %s1081_s29, 0 }
  0x1f   : > { %p61_p10 = scmp.ne.s32.totalorder %s1065_s25, %s1061_s24  ;;  %s1367_s13 = smov (%p41_p7, %s39_s13), 0 }
  0x20   : > { %1350 = sst [smem:[#allocation19_spill]] %s1367_s13  ;;  %p1202_p11 = por %p56_p9, %p55_p8 }
  0x21   : > { %p1208_p12 = por %p62_p1, %p61_p10  ;;  %s43_s17 = ssub.s32 %s1077_s28, %s1367_s13 }
  0x22   : > { %p220_p13 = scmp.eq.s32.totalorder %s1159_s30, 1  ;;  %p46_p0 = scmp.eq.s32.totalorder %s43_s17, 0 }
  0x23   : > { %p226_p2 = scmp.eq.s32.totalorder %s711_s10, 1  ;;  %p772_p5 = scmp.lt.s32.totalorder %s1081_s29, 2 }
  0x24   : > { %p1215_p4 = por %p220_p13, %p55_p8  ;;  %s294_s21 = sand.u32 1, %s1069_s26  }
  0x25   : > { %s1221_s19 = scalar_select %p46_p0, %s1069_s26, %s48_s15  }
  0x26   : > { %p1223_p7 = por %p226_p2, %p61_p10  ;;  %s717_s22 = sshll.u32 %s294_s21, 3 }
  0x27   : > { %1354 = sst [smem:[#allocation20_spill]] %s1221_s19  ;;  %s718_s23 = sshll.u32 %s1077_s28, 3 }
  0x28   : > { %s1355_s20 = scalar_select %p1223_p7, 1, 0 }
  0x29   : > { %s303_s12 = scalar_lea.hbm %s1328_s0, %s718_s23  ;;  %s298_s10 = scalar_lea.vmem [#allocation2], %s717_s22 }
  0x2a   : > { %1356 = sst [smem:[#allocation21_spill]] %s1355_s20  ;;  %s307_s17 = sshll.u32 %s298_s10, 4  ;;  %s308_s17 = int_to_ptr.vmem [resolvable:$true] %s307_s17 }
  0x2b   : > { %s305_s4 = sshll.u32 %s303_s12, 4  ;;  %p759_p8 = pnand %p772_p5, %p1202_p11  ;;  %s306_s4 = int_to_ptr.hbm [resolvable:$true] %s305_s4 }
  0x2c   : > { %s314_s15 = sand.u32 1, %s1081_s29   ;;  %s295_s5 = scalar_lea.sflag [#allocation3], %s294_s21 }
  0x2d   : > { %761 = dma.hbm_to_vmem [thread:$0]  (!%p759_p8), %s306_s4, 128, %s308_s17, %s295_s5  }
  0x2e   : > { %s321_s19 = scalar_lea.hbm %s1329_s1, %s1077_s28  ;;  %s317_s26 = scalar_lea.vmem [#allocation5], %s294_s21 }
  0x2f   : > { %s325_s20 = sshll.u32 %s317_s26, 4  ;;  %s323_s24 = sshll.u32 %s321_s19, 4  ;;  %s326_s20 = int_to_ptr.vmem [resolvable:$true] %s325_s20  ;;  %s324_s24 = int_to_ptr.hbm [resolvable:$true] %s323_s24 }
  0x30   : > { %s315_s23 = scalar_lea.sflag [#allocation6], %s314_s15  ;;  %334 = sbr.rel (%p1167_p3) target bundleno = 360 (0x168), region = 48 }
  0x31   : > { %764 = dma.hbm_to_vmem [thread:$0]  (!%p759_p8), %s324_s24, 16, %s326_s20, %s315_s23  }
  0x32   : > { %s1242_s16 = sand.u32 (!%p1167_p3), 1, %s1065_s25  }
  0x33   : > { %s720_s4 = sshll.u32 (!%p1167_p3), %s1242_s16, 3  ;;  %s337_s5 = scalar_lea.sflag (!%p1167_p3), [#allocation3], %s1242_s16 }
  0x34   : > { %s1248_s6 = scalar_lea.vmem (!%p1167_p3), [#allocation2], %s720_s4 }
  0x35   : > { %1040 = dma.done.wait (%p1208_p12), %s337_s5, 128  }
  0x36   : > { %1042 = vsyncadd (%p1208_p12), %s337_s5, 4294967168  ;;  %s346_s24 = sand.u32 1, %s1159_s30   ;;  %s349_s11 = scalar_lea.vmem [#allocation5], %s1242_s16 }
  0x37   : > { %s347_s26 = scalar_lea.sflag [#allocation6], %s346_s24 }
  0x38   : > { %1044 = dma.done.wait (%p1208_p12), %s347_s26, 16  }
  0x39   : > { %1046 = vsyncadd (%p1208_p12), %s347_s26, 4294967280 }
  0x3a   : > { %1048 = dma.done.wait (%p62_p1), [#allocation6], 2048  }
  0x3b   : > { %1050 = vsyncadd (%p62_p1), [#allocation6], 4294965248 }
  0x3c   : > { %1052 = dma.done.wait (%p62_p1), [#allocation9], 4096  }
  0x3d   : > { %1054 = vsyncadd (%p62_p1), [#allocation9], 4294963200  ;;  %v449_v0 = vld [vmem:[#allocation7 + $0x78] sm:$0xff]  ;;  %v448_v1 = vld [vmem:[#allocation7 + $0x70] sm:$0xff]  ;;  %v403_v10 = vlaneseq  ;;  %s727_s9 = sshll.u32 %s1073_s27, 3  ;;  %s399_s15 = scalar_lea.vmem [#allocation11], %s720_s4 }
  0x3e   : > { %450 = vmatpush.msra.mxu0 %v449_v0  ;;  %v447_v2 = vld [vmem:[#allocation7 + $0x68] sm:$0xff]  ;;  %v446_v3 = vld [vmem:[#allocation7 + $0x60] sm:$0xff]  ;;  %v445_v4 = vld [vmem:[#allocation7 + $0x58] sm:$0xff]  ;;  %s577_s17 = scalar_lea.hbm %s1335_s7, %s727_s9  ;;  %s579_s23 = sshll.u32 %s399_s15, 4  ;;  %s580_s23 = int_to_ptr.vmem [resolvable:$true] %s579_s23 }
  0x3f   : > { %v485_v5 = vld [vmem:[#allocation10 + $0x78] sm:$0xff]  ;;  %v484_v6 = vld [vmem:[#allocation10 + $0x70] sm:$0xff]  ;;  %v483_v8 = vld [vmem:[#allocation10 + $0x68] sm:$0xff]  ;;  %v404_v19 = vshrl.u32 %v403_v10, 7  ;;  %s581_s5 = sshll.u32 %s577_s17, 4  ;;  %s566_s27 = scalar_lea.sflag [#allocation4], %s1242_s16  ;;  %s582_s5 = int_to_ptr.hbm [resolvable:$true] %s581_s5 }
  0x40   : > { %451 = vmatpush.msra.mxu0 %v448_v1  ;;  %486 = vmatpush.msra.mxu1 %v485_v5  ;;  %v444_v7 = vld [vmem:[#allocation7 + $0x50] sm:$0xff]  ;;  %v443_v9 = vld [vmem:[#allocation7 + $0x48] sm:$0xff]  ;;  %v482_v11 = vld [vmem:[#allocation10 + $0x60] sm:$0xff]  ;;  %s1007_s4 = scalar_lea.hbm %s1335_s7, 16 }
  0x41   : > { %v442_v12 = vld [vmem:[#allocation7 + $0x40] sm:$0xff]  ;;  %v481_v13 = vld [vmem:[#allocation10 + $0x58] sm:$0xff]  ;;  %v412_v14 = vld [vmem:[%s1330_s2] sm:$0x1]  ;;  %vm405_vm0 = vcmp.eq.s32.totalorder %v404_v19, 0 }
  0x42   : > { %452 = vmatpush.msra.mxu0 %v447_v2  ;;  %487 = vmatpush.msra.mxu1 %v484_v6  ;;  %v523_v15 = vld [vmem:[#allocation8 + $0x78] sm:$0xff]  ;;  %v522_v16 = vld [vmem:[#allocation8 + $0x70] sm:$0xff]  ;;  %v521_v21 = vld [vmem:[#allocation8 + $0x68] sm:$0xff]  ;;  %v418_v23 = vsub.f32 1.0, %v412_v14 }
  0x43   : > { %v441_v17 = vld [vmem:[#allocation7 + $0x38] sm:$0xff]  ;;  %v480_v20 = vld [vmem:[#allocation10 + $0x50] sm:$0xff]  ;;  %524 = vmatpush.msra.mxu2 %v523_v15  ;;  %v479_v24 = vld [vmem:[#allocation10 + $0x48] sm:$0xff] }
  0x44   : > { %453 = vmatpush.msra.mxu0 %v446_v3  ;;  %488 = vmatpush.msra.mxu1 %v483_v8  ;;  %v1272_v18 = vld [vmem:[%s1248_s6] sm:$0xff]  ;;  %v520_v27 = vld [vmem:[#allocation8 + $0x60] sm:$0xff]  ;;  %v420_v34 = vperm.slane %v418_v23, 0  ;;  %s1001_s6 = sshra.s32 %s582_s5, 4  ;;  %s1002_s6 = int_to_ptr.hbm [resolvable:$true] %s1001_s6 }
  0x45   : > { %v440_v22 = vld [vmem:[#allocation7 + $0x30] sm:$0xff]  ;;  %525 = vmatpush.msra.mxu2 %v522_v16  ;;  %v402_v25 = vrot.slane %v1272_v18, 7  ;;  %v830_v26 = vld [vmem:[%s349_s11] ss:$0 sm:$0xff]  ;;  %v478_v29 = vld [vmem:[#allocation10 + $0x40] sm:$0xff]  ;;  %s1003_s24 = scalar_lea.hbm %s1002_s6, 8  ;;  %p1008_p10 = scmp.lt.s32.totalorder %s1002_s6, %s1335_s7 }
  0x46   : > { %454 = vmatpush.msra.mxu0 %v445_v4  ;;  %489 = vmatpush.msra.mxu1 %v482_v11  ;;  %v439_v28 = vld [vmem:[#allocation7 + $0x28] sm:$0xff]  ;;  %v519_v31 = vld [vmem:[#allocation8 + $0x58] sm:$0xff]  ;;  %v438_v32 = vld [vmem:[#allocation7 + $0x20] sm:$0xff]  ;;  %p1004_p1 = scmp.ne.s32.totalorder %s1002_s6, %s1003_s24  ;;  %p1009_p11 = scmp.lt.s32.totalorder %s1007_s4, %s1003_s24 }
  0x47   : > { %526 = vmatpush.msra.mxu2 %v521_v21  ;;  %v413_v30 = vld [vmem:[%s1331_s3] sm:$0x1]  ;;  %v477_v35 = vld [vmem:[#allocation10 + $0x38] sm:$0xff]  ;;  %v411_v36 = vsel %vm405_vm0, %v830_v26, %v402_v25  ;;  %v518_v37 = vld [vmem:[#allocation8 + $0x50] sm:$0xff] }
  0x48   : > { %455 = vmatpush.msra.mxu0 %v444_v7  ;;  %490 = vmatpush.msra.mxu1 %v481_v13  ;;  %v831_v33 = vld [vmem:[%s1330_s2] ss:$0 sm:$0xff]  ;;  %v437_v38 = vld [vmem:[#allocation7 + $0x18] sm:$0xff]  ;;  %v476_v39 = vld [vmem:[#allocation10 + $0x30] sm:$0xff]  ;;  %v428_v40 = vsub.f32 1.0, %v413_v30  ;;  %v422_v44 = vmul.f32 %v420_v34, %v411_v36  ;;  %p1005_p3 = pnand %p1004_p1, %p1215_p4  ;;  %p1010_p12 = por %p1009_p11, %p1008_p10 }
  0x49   : > { %527 = vmatpush.msra.mxu2 %v520_v27  ;;  %v517_v41 = vld [vmem:[#allocation8 + $0x48] sm:$0xff]  ;;  %v436_v42 = vld [vmem:[#allocation7 + $0x10] sm:$0xff]  ;;  %v417_v43 = vmul.f32 %v831_v33, %v1272_v18  ;;  %v516_v46 = vld [vmem:[#allocation8 + $0x40] sm:$0xff] }
  0x4a   : > { %456 = vmatpush.msra.mxu0 %v443_v9  ;;  %491 = vmatpush.msra.mxu1 %v480_v20  ;;  %v475_v45 = vld [vmem:[#allocation10 + $0x28] sm:$0xff]  ;;  %v474_v48 = vld [vmem:[#allocation10 + $0x20] sm:$0xff]  ;;  %v430_v50 = vperm.slane %v428_v40, 0  ;;  %v515_v51 = vld [vmem:[#allocation8 + $0x38] sm:$0xff]  ;;  %p1006_p9 = pneg %p1005_p3 }
  0x4b   : > { %528 = vmatpush.msra.mxu2 %v519_v31  ;;  %v435_v47 = vld [vmem:[#allocation7 + $0x8] sm:$0xff]  ;;  %v434_v52 = vld [vmem:[#allocation7] sm:$0xff]  ;;  %v423_v53 = vadd.f32 %v422_v44, %v417_v43  ;;  %v473_v54 = vld [vmem:[#allocation10 + $0x18] sm:$0xff] }
  0x4c   : > { %457 = vmatpush.msra.mxu0 %v442_v12  ;;  %492 = vmatpush.msra.mxu1 %v479_v24  ;;  %v832_v49 = vld [vmem:[%s1331_s3] ss:$0 sm:$0xff]  ;;  %v514_v55 = vld [vmem:[#allocation8 + $0x30] sm:$0xff]  ;;  %v432_v58 = vmul.f32 %v430_v50, %v411_v36  ;;  %v512_v61 = vld [vmem:[#allocation8 + $0x20] sm:$0xff]  ;;  %p1011_p13 = pnand %p1010_p12, %p1006_p9 }
  0x4d   : > { %529 = vmatpush.msra.mxu2 %v518_v37  ;;  %v472_v56 = vld [vmem:[#allocation10 + $0x10] sm:$0xff]  ;;  %v427_v57 = vmul.f32 %v832_v49, %v1272_v18  ;;  %v513_v59 = vld [vmem:[#allocation8 + $0x28] sm:$0xff]  ;;  %v470_v62 = vld [vmem:[#allocation10] sm:$0xff] }
  0x4e   : > { %458 = vmatpush.msra.mxu0 %v441_v17  ;;  %493 = vmatpush.msra.mxu1 %v478_v29  ;;  %v471_v60 = vld [vmem:[#allocation10 + $0x8] sm:$0xff]  ;;  %v511_v0 = vld [vmem:[#allocation8 + $0x18] sm:$0xff]  ;;  %v510_v1 = vld [vmem:[#allocation8 + $0x10] sm:$0xff] }
  0x4f   : > { %530 = vmatpush.msra.mxu2 %v517_v41  ;;  %v433_v63 = vadd.f32 %v432_v58, %v427_v57  ;;  %v509_v2 = vld [vmem:[#allocation8 + $0x8] sm:$0xff]  ;;  %v508_v3 = vld [vmem:[#allocation8] sm:$0xff] }
  0x50   : > { %459 = vmatpush.msra.mxu0 %v440_v22  ;;  %494 = vmatpush.msra.mxu1 %v477_v35 }
  0x51   : > { %531 = vmatpush.msra.mxu2 %v516_v46 }
  0x52   : > { %460 = vmatpush.msra.mxu0 %v439_v28  ;;  %495 = vmatpush.msra.mxu1 %v476_v39 }
  0x53   : > { %532 = vmatpush.msra.mxu2 %v515_v51 }
  0x54   : > { %461 = vmatpush.msra.mxu0 %v438_v32  ;;  %496 = vmatpush.msra.mxu1 %v475_v45 }
  0x55   : > { %533 = vmatpush.msra.mxu2 %v514_v55 }
  0x56   : > { %462 = vmatpush.msra.mxu0 %v437_v38  ;;  %497 = vmatpush.msra.mxu1 %v474_v48 }
  0x57   : > { %534 = vmatpush.msra.mxu2 %v513_v59 }
  0x58   : > { %463 = vmatpush.msra.mxu0 %v436_v42  ;;  %498 = vmatpush.msra.mxu1 %v473_v54 }
  0x59   : > { %535 = vmatpush.msra.mxu2 %v512_v61 }
  0x5a   : > { %464 = vmatpush.msra.mxu0 %v435_v47  ;;  %499 = vmatpush.msra.mxu1 %v472_v56 }
  0x5b   : > { %536 = vmatpush.msra.mxu2 %v511_v0 }
  0x5c   : > { %465 = vmatpush.msra.mxu0 %v434_v52  ;;  %500 = vmatpush.msra.mxu1 %v471_v60 }
  0x5d   : > { %466 = vmatmul.f32.vlgmr.msra.gmra.mxu0 %v423_v53  ;;  %537 = vmatpush.msra.mxu2 %v510_v1 }
  0x5e   : > { %501 = vmatpush.msra.mxu1 %v470_v62 }
  0x5f   : > { %502 = vmatmul.f32.vlgmr.msra.gmra.mxu1 %v433_v63  ;;  %538 = vmatpush.msra.mxu2 %v509_v2 }
  0x61   : > { %539 = vmatpush.msra.mxu2 %v508_v3 }
  0xda   : > { %v467_v4 = vpop.f32.mrf.mxu0 }
  0xdb   : > { %v506_v5 = vmax.f32 %v467_v4, 0.0 }
  0xdc   : > { %v503_v7 = vpop.f32.mrf.mxu1 }
  0xdd   : > { %v507_v6 = vmul.f32 %v506_v5, %v506_v5  ;;  %v725_v8 = vmul.f32 -1.442695, %v503_v7 }
  0xdf   : > { %540 = vmatmul.f32.vlgmr.msra.gmra.mxu2 %v507_v6  ;;  %833 = vpow2.f32 %v725_v8 }
  0xe5   : > { %v834_v9 = vpop.eup %833 }
  0xe6   : > { %v547_v10 = vadd.f32 1.0, %v834_v9 }
  0xe8   : > { %835 = vrcp.f32 %v547_v10  ;;  %vm553_vm1 = vweird.f32 %v547_v10  ;;  %v559_v15 = vand.u32 2147483648, %v547_v10  ;;  %v557_v17 = vand.u32 2147483647, %v547_v10 }
  0xea   : > { %v560_v18 = vor.u32 1.1754944e-38, %v559_v15  ;;  %vm558_vm4 = vcmp.eq.f32.partialorder %v557_v17, 8.507059e+37 }
  0xee   : > { %v836_v11 = vpop.eup %835 }
  0xef   : > { %v549_v12 = vmul.f32 %v836_v11, %v547_v10  ;;  %vm554_vm2 = vweird.f32 %v836_v11 }
  0xf0   : > { %vm555_vm3 = vmor %vm553_vm1, %vm554_vm2 }
  0xf1   : > { %v550_v13 = vsub.f32 1.0, %v549_v12 }
  0xf3   : > { %v551_v14 = vmul.f32 %v836_v11, %v550_v13 }
  0xf5   : > { %v552_v16 = vadd.f32 %v836_v11, %v551_v14 }
  0xf7   : > { %v556_v19 = vsel %vm555_vm3, %v836_v11, %v552_v16 }
  0xf8   : > { %v561_v21 = vsel %vm558_vm4, %v560_v18, %v556_v19 }
 0x162   : > { %v541_v20 = vpop.f32.mrf.mxu2 }
 0x163   : > { %v563_v22 = vmul.f32 %v561_v21, %v541_v20 }
 0x165   : > { %564 = vst [vmem:[%s399_s15] sm:$0xff] %v563_v22 }
 0x166   : > { %1014 = shalt.err (!%p1011_p13)
}
 0x167   : > { %746 = dma.vmem_to_hbm [thread:$0]  (%p1215_p4), %s580_s23, 128, %s582_s5, %s566_s27  }
 0x168 PF: > { %s1357_s16 = sld [smem:[#allocation17_spill]]  ;;  %p766_p0 = pnand %p716_p6, %p1223_p7 }
 0x16a   : > { %p767_p2 = pneg %p766_p0 }
 0x16e   : > { %s593_s19 = sand.u32 1, %s1357_s16  }
 0x16f   : > { %s594_s20 = scalar_lea.sflag [#allocation4], %s593_s19 }
 0x170   : > { %1056 = dma.done.wait (%p767_p2), %s594_s20, 128  }
 0x171   : > { %1058 = vsyncadd (%p767_p2), %s594_s20, 4294967168  ;;  %s27_s29 = sadd.s32 1, %s1081_s29   ;;  %s1359_s21 = sld [smem:[#allocation18_spill]] }
 0x172   : > { %p24_p5 = scmp.ge.s32.totalorder %s27_s29, 4   ;;  %s1360_s26 = sld [smem:[#allocation20_spill]] }
 0x173   : > { %s1361_s18 = sld [smem:[#allocation19_spill]]  ;;  %s1362_s24 = smov %s1065_s25 }
 0x174   : > { %s1364_s27 = smov %s1077_s28 }
 0x175   :  { %26 = sbr.rel (!%p24_p5) target bundleno = 13 (0xd), region = 118 }
 0x177   : > { %s1363_s25 = smov %s1359_s21 }
 0x179   : > { %s1365_s28 = smov %s1361_s18 }
 0x17a   :  { %600 = vsyncpa [#allocation3], 1 }
 0x17b   :  { %602 = vsyncpa [#allocation3 + $0x1], 1 }
 0x17c   :  { %603 = vsyncpa [#allocation6], 1 }
 0x17d   :  { %605 = vsyncpa [#allocation6 + $0x1], 1 }
 0x17e   :  { %606 = vsyncpa [#allocation9], 1 }
 0x17f   :  { %607 = vsyncpa [#allocation4], 1 }
 0x180   :  { %609 = vsyncpa [#allocation4 + $0x1], 1 }

</bundles_post_ra>
